<compile_context>
chip_gen: v5e
topology: v5e:2x2
jax: 0.10.0
libtpu: 0.0.40
codegen_flags: <defaults>
</compile_context>

<pallas_src>
import jax
import jax.numpy as jnp
from jax.experimental import pallas as pl
from jax.experimental.pallas import tpu as pltpu

# ---- synthetic config (module __init__ tells us the shapes) -----------------
HIDDEN   = 32          # config.hidden
CLASSNUM = 32          # len(cmap.encodemap) -- synthetic deterministic value
SOS_IDX  = 1           # cmap.encode('<sos>') -- synthetic deterministic value
BATCH    = 2
SEQ      = 8           # T (only t=0 is consumed by the runnable forward)

B_PAD = 8              # sublane-dense batch tile
C_PAD = 128            # lane-dense width used for gates, weights and output


def speller_kernel(x_ref, w_ref, b_ref, y_ref):
    """Single-block kernel: 2-layer LSTM step (zero init state) + linear head.

    x_ref : (8, 128)       s[:,0,:] in lanes [0:64), zeros elsewhere, batch padded to 8
    w_ref : (3, 128, 128)  fused lane-packed weights: [0]=LSTM layer0, [1]=LSTM layer1,
                           [2]=CharacterDistribution head.  Gate lane layout per
                           LSTM slab: [0:32)=i, [32:64)=o, [64:96)=g, [96:128)=0.
                           Live K rows: layer0 rows [0:64), layer1 rows [32:64),
                           head rows [32:64) (everything else zero).
    b_ref : (3, 8, 128)    matching biases, pre-broadcast over the 8 sublanes
    y_ref : (8, 128)       lane/sublane-dense output slab (valid: [:B, :C])
    """
    H = HIDDEN
    f32 = jnp.float32
    lane = jax.lax.broadcasted_iota(jnp.int32, (B_PAD, C_PAD), 1)
    is_tanh = (lane >= 2 * H) & (lane < 3 * H)          # g-gate lanes [64:96)

    def lstm_step(x, layer):
        # One fused MXU dot for all gates of this layer.
        gates = jnp.dot(x, w_ref[layer], preferred_element_type=f32) + b_ref[layer]
        # Two wide EUP passes (sigmoid + tanh) selected per lane group.
        act = jnp.where(is_tanh, jnp.tanh(gates), jax.nn.sigmoid(gates))
        # c0 == 0  =>  c = sigmoid(i) * tanh(g).  The 64-lane roll is its own
        # inverse mod 128, so i*g lands at BOTH lanes [0:32) and [64:96)
        # regardless of the roll sign convention.
        c = act * pltpu.roll(act, shift=2 * H, axis=1)
        # h = sigmoid(o) * tanh(c).  tanh(i*g) is duplicated at [0:32) and
        # [64:96), so a 32-lane roll of either sign puts a copy under the o
        # lanes [32:64).
        h = act * pltpu.roll(jnp.tanh(c), shift=H, axis=1)
        return h                                        # live value in lanes [32:64)

    h1   = lstm_step(x_ref[...], 0)                     # layer-0 hidden (lanes [32:64))
    feat = lstm_step(h1, 1)                             # layer-1 hidden (lanes [32:64))

    # CharacterDistribution: attention half is zeros, so only the feature half
    # of the head weight is live (rows [32:64) of w_ref[2]); garbage lanes of
    # `feat` hit zero rows and contribute nothing.
    y = jnp.dot(feat, w_ref[2], preferred_element_type=f32) + b_ref[2]
    y_ref[...] = y.astype(y_ref.dtype)


def init_params(key):
    """Deterministic PyTorch-shaped parameters (uniform(-1/sqrt(H), 1/sqrt(H)))."""
    H, C = HIDDEN, CLASSNUM
    k = 1.0 / jnp.sqrt(jnp.float32(H))
    ks = jax.random.split(key, 8)
    u = lambda kk, shape: jax.random.uniform(kk, shape, jnp.float32, -k, k)
    return dict(
        w_ih_l0=u(ks[0], (4 * H, 2 * H + C)),
        b_ih_l0=u(ks[1], (4 * H,)),
        b_hh_l0=u(ks[2], (4 * H,)),
        w_ih_l1=u(ks[3], (4 * H, H)),
        b_ih_l1=u(ks[4], (4 * H,)),
        b_hh_l1=u(ks[5], (4 * H,)),
        w_cd=u(ks[6], (C, 2 * H)),
        b_cd=u(ks[7], (C,)),
    )


def _fuse_gate_weights(w, b, k_offset):
    """Pack a PyTorch gate-stacked LSTM input weight (4H, Kin) and summed bias
    (4H,) into a single lane-packed (128, 128) weight / (128,) bias with lane
    layout [i | o | g | pad].  The forget gate is dropped (exact: c0 == 0).
    Live K rows are placed at [k_offset, k_offset+Kin); all other rows zero so
    garbage lanes of the activation vreg feeding this matmul contribute 0."""
    H = HIDDEN
    Kin = w.shape[1]
    W = jnp.zeros((C_PAD, C_PAD), jnp.float32)
    B = jnp.zeros((C_PAD,), jnp.float32)
    for lane_grp, g in ((0, 0), (1, 3), (2, 2)):        # i -> [0:32), o -> [32:64), g -> [64:96)
        W = W.at[k_offset:k_offset + Kin,
                 lane_grp * H:(lane_grp + 1) * H].set(w[g * H:(g + 1) * H, :].T)
        B = B.at[lane_grp * H:(lane_grp + 1) * H].set(b[g * H:(g + 1) * H])
    return W, B


def prepare_params(p):
    """One-time algebraic prep (off the hot path): fold SOS one-hot + biases,
    drop the dead forget gate and the zero attention half, transpose, lane-pack
    gates, and collapse everything into two pre-padded slabs."""
    H, C = HIDDEN, CLASSNUM

    # LSTM layer 0: SOS one-hot column folded into the bias; only the first 2H
    # input columns stay live.
    w0 = p["w_ih_l0"]                                          # (4H, 2H + C)
    b0 = p["b_ih_l0"] + p["b_hh_l0"] + w0[:, 2 * H + SOS_IDX]  # (4H,)
    W0, B0 = _fuse_gate_weights(w0[:, :2 * H], b0, k_offset=0)

    # LSTM layer 1: input is h1, which the kernel carries in lanes [32:64).
    W1, B1 = _fuse_gate_weights(p["w_ih_l1"], p["b_ih_l1"] + p["b_hh_l1"],
                                k_offset=H)

    # Head: attention_score == 0, so only the feature half of the weight is
    # live; feature sits in lanes [32:64) -> rows [32:64).  Output lanes padded
    # to 128 for an unmasked store.
    Wcd = jnp.zeros((C_PAD, C_PAD), jnp.float32).at[H:2 * H, :C].set(p["w_cd"][:, :H].T)
    Bcd = jnp.zeros((C_PAD,), jnp.float32).at[:C].set(p["b_cd"])

    w_slab = jnp.stack([W0, W1, Wcd])                          # (3, 128, 128)
    b_slab = jnp.stack([jnp.broadcast_to(b, (B_PAD, C_PAD))
                        for b in (B0, B1, Bcd)])               # (3, 8, 128)
    return (jax.block_until_ready(w_slab), jax.block_until_ready(b_slab))


def speller_forward(s, prep):
    """Per-call wrapper: slice t=0, pad batch to 8 sublanes and input lanes to
    128, run the single-block kernel (3 operand DMAs), slice back to (B, C)."""
    B = s.shape[0]
    w_slab, b_slab = prep
    s0 = s[:, 0, :]                                            # s[:, :1].squeeze(1)
    x = jnp.zeros((B_PAD, C_PAD), s.dtype).at[:B, :2 * HIDDEN].set(s0)
    y_pad = pl.pallas_call(
        speller_kernel,
        out_shape=jax.ShapeDtypeStruct((B_PAD, C_PAD), s.dtype),
        in_specs=[pl.BlockSpec(memory_space=pltpu.MemorySpace.VMEM)] * 3,
        out_specs=pl.BlockSpec(memory_space=pltpu.MemorySpace.VMEM),
    )(x, w_slab, b_slab)
    return y_pad[:B, :CLASSNUM]


def speller_reference(s, p):
    """Pure-JAX reference of the original (unfolded) forward math."""
    B = s.shape[0]
    H, C = HIDDEN, CLASSNUM
    sos = jax.nn.one_hot(jnp.full((B,), SOS_IDX), C, dtype=s.dtype)
    x0 = jnp.concatenate([s[:, 0, :], sos], axis=-1)
    g0 = x0 @ p["w_ih_l0"].T + p["b_ih_l0"] + p["b_hh_l0"]
    i0, f0, gg0, o0 = jnp.split(g0, 4, axis=-1)
    c1 = jax.nn.sigmoid(i0) * jnp.tanh(gg0)
    h1 = jax.nn.sigmoid(o0) * jnp.tanh(c1)
    g1 = h1 @ p["w_ih_l1"].T + p["b_ih_l1"] + p["b_hh_l1"]
    i1, f1, gg1, o1 = jnp.split(g1, 4, axis=-1)
    c2 = jax.nn.sigmoid(i1) * jnp.tanh(gg1)
    feat = jax.nn.sigmoid(o1) * jnp.tanh(c2)
    z = jnp.concatenate([feat, jnp.zeros((B, H), s.dtype)], axis=-1)
    return z @ p["w_cd"].T + p["b_cd"]


if __name__ == "__main__":
    key = jax.random.PRNGKey(0)
    s = jax.random.normal(key, (BATCH, SEQ, 2 * HIDDEN), dtype=jnp.float32)
    params = init_params(jax.random.PRNGKey(42))

    prep = prepare_params(params)             # one-time weight prep (off hot path)
    fwd = jax.jit(speller_forward)            # fuse pad/slice around the kernel

    y = jax.block_until_ready(fwd(s, prep))

    y_ref = speller_reference(s, params)
    assert y.shape == (BATCH, CLASSNUM)
    assert jnp.allclose(y, y_ref, atol=1e-4, rtol=1e-4), "mismatch vs reference"
    print("KERNEL_OK")
</pallas_src>

<mosaic_0001>
module attributes {stable_mosaic.version = 11 : i64} {
  func.func @speller_kernel(%arg0: memref<8x128xf32, #tpu.memory_space<vmem>>, %arg1: memref<3x128x128xf32, #tpu.memory_space<vmem>>, %arg2: memref<3x8x128xf32, #tpu.memory_space<vmem>>, %arg3: memref<8x128xf32, #tpu.memory_space<vmem>>) attributes {dimension_semantics = [], scalar_prefetch = 0 : i64, scratch_operands = 0 : i64, tpu.core_type = #tpu.core_type<tc>} {
    %0 = tpu.iota {dimensions = array<i32: 1>} : vector<8x128xi32>
    %c64_i32 = arith.constant 64 : i32
    %1 = vector.broadcast %c64_i32 : i32 to vector<8x128xi32>
    %2 = arith.cmpi sge, %0, %1 : vector<8x128xi32>
    %c96_i32 = arith.constant 96 : i32
    %3 = vector.broadcast %c96_i32 : i32 to vector<8x128xi32>
    %4 = arith.cmpi slt, %0, %3 : vector<8x128xi32>
    %5 = arith.andi %2, %4 : vector<8x128xi1>
    %c0 = arith.constant 0 : index
    %c0_0 = arith.constant 0 : index
    %6 = vector.load %arg0[%c0, %c0_0] : memref<8x128xf32, #tpu.memory_space<vmem>>, vector<8x128xf32>
    %c0_1 = arith.constant 0 : index
    %c0_2 = arith.constant 0 : index
    %c0_3 = arith.constant 0 : index
    %7 = vector.load %arg1[%c0_1, %c0_2, %c0_3] : memref<3x128x128xf32, #tpu.memory_space<vmem>>, vector<1x128x128xf32>
    %8 = vector.shape_cast %7 : vector<1x128x128xf32> to vector<128x128xf32>
    %cst = arith.constant dense<0.000000e+00> : vector<8x128xf32>
    %9 = tpu.matmul %6, %8, %cst {dimension_numbers = #tpu.dot_dimension_numbers<[1], [0], [0], [1], [0, 0, 1, 1], [], []>} : vector<8x128xf32>, vector<128x128xf32>, vector<8x128xf32> -> vector<8x128xf32>
    %c0_4 = arith.constant 0 : index
    %c0_5 = arith.constant 0 : index
    %c0_6 = arith.constant 0 : index
    %10 = vector.load %arg2[%c0_4, %c0_5, %c0_6] : memref<3x8x128xf32, #tpu.memory_space<vmem>>, vector<1x8x128xf32>
    %11 = vector.shape_cast %10 : vector<1x8x128xf32> to vector<8x128xf32>
    %12 = arith.addf %9, %11 : vector<8x128xf32>
    %13 = math.tanh %12 : vector<8x128xf32>
    %14 = arith.negf %12 : vector<8x128xf32>
    %15 = math.exp %14 : vector<8x128xf32>
    %cst_7 = arith.constant 1.000000e+00 : f32
    %16 = vector.broadcast %cst_7 : f32 to vector<8x128xf32>
    %17 = arith.addf %16, %15 : vector<8x128xf32>
    %18 = arith.divf %16, %17 : vector<8x128xf32>
    %19 = arith.select %5, %13, %18 : vector<8x128xi1>, vector<8x128xf32>
    %c64_i32_8 = arith.constant 64 : i32
    %20 = tpu.dynamic_rotate %19 by %c64_i32_8 dim 1 : vector<8x128xf32>, i32 -> vector<8x128xf32>
    %21 = arith.mulf %19, %20 : vector<8x128xf32>
    %22 = math.tanh %21 : vector<8x128xf32>
    %c32_i32 = arith.constant 32 : i32
    %23 = tpu.dynamic_rotate %22 by %c32_i32 dim 1 : vector<8x128xf32>, i32 -> vector<8x128xf32>
    %24 = arith.mulf %19, %23 : vector<8x128xf32>
    %c1 = arith.constant 1 : index
    %c0_9 = arith.constant 0 : index
    %c0_10 = arith.constant 0 : index
    %25 = vector.load %arg1[%c1, %c0_9, %c0_10] : memref<3x128x128xf32, #tpu.memory_space<vmem>>, vector<1x128x128xf32>
    %26 = vector.shape_cast %25 : vector<1x128x128xf32> to vector<128x128xf32>
    %cst_11 = arith.constant dense<0.000000e+00> : vector<8x128xf32>
    %27 = tpu.matmul %24, %26, %cst_11 {dimension_numbers = #tpu.dot_dimension_numbers<[1], [0], [0], [1], [0, 0, 1, 1], [], []>} : vector<8x128xf32>, vector<128x128xf32>, vector<8x128xf32> -> vector<8x128xf32>
    %c1_12 = arith.constant 1 : index
    %c0_13 = arith.constant 0 : index
    %c0_14 = arith.constant 0 : index
    %28 = vector.load %arg2[%c1_12, %c0_13, %c0_14] : memref<3x8x128xf32, #tpu.memory_space<vmem>>, vector<1x8x128xf32>
    %29 = vector.shape_cast %28 : vector<1x8x128xf32> to vector<8x128xf32>
    %30 = arith.addf %27, %29 : vector<8x128xf32>
    %31 = math.tanh %30 : vector<8x128xf32>
    %32 = arith.negf %30 : vector<8x128xf32>
    %33 = math.exp %32 : vector<8x128xf32>
    %cst_15 = arith.constant 1.000000e+00 : f32
    %34 = vector.broadcast %cst_15 : f32 to vector<8x128xf32>
    %35 = arith.addf %34, %33 : vector<8x128xf32>
    %36 = arith.divf %34, %35 : vector<8x128xf32>
    %37 = arith.select %5, %31, %36 : vector<8x128xi1>, vector<8x128xf32>
    %c64_i32_16 = arith.constant 64 : i32
    %38 = tpu.dynamic_rotate %37 by %c64_i32_16 dim 1 : vector<8x128xf32>, i32 -> vector<8x128xf32>
    %39 = arith.mulf %37, %38 : vector<8x128xf32>
    %40 = math.tanh %39 : vector<8x128xf32>
    %c32_i32_17 = arith.constant 32 : i32
    %41 = tpu.dynamic_rotate %40 by %c32_i32_17 dim 1 : vector<8x128xf32>, i32 -> vector<8x128xf32>
    %42 = arith.mulf %37, %41 : vector<8x128xf32>
    %c2 = arith.constant 2 : index
    %c0_18 = arith.constant 0 : index
    %c0_19 = arith.constant 0 : index
    %43 = vector.load %arg1[%c2, %c0_18, %c0_19] : memref<3x128x128xf32, #tpu.memory_space<vmem>>, vector<1x128x128xf32>
    %44 = vector.shape_cast %43 : vector<1x128x128xf32> to vector<128x128xf32>
    %cst_20 = arith.constant dense<0.000000e+00> : vector<8x128xf32>
    %45 = tpu.matmul %42, %44, %cst_20 {dimension_numbers = #tpu.dot_dimension_numbers<[1], [0], [0], [1], [0, 0, 1, 1], [], []>} : vector<8x128xf32>, vector<128x128xf32>, vector<8x128xf32> -> vector<8x128xf32>
    %c2_21 = arith.constant 2 : index
    %c0_22 = arith.constant 0 : index
    %c0_23 = arith.constant 0 : index
    %46 = vector.load %arg2[%c2_21, %c0_22, %c0_23] : memref<3x8x128xf32, #tpu.memory_space<vmem>>, vector<1x8x128xf32>
    %47 = vector.shape_cast %46 : vector<1x8x128xf32> to vector<8x128xf32>
    %48 = arith.addf %45, %47 : vector<8x128xf32>
    %c0_24 = arith.constant 0 : index
    %c0_25 = arith.constant 0 : index
    %49 = vector.load %arg3[%c0_24, %c0_25] : memref<8x128xf32, #tpu.memory_space<vmem>>, vector<8x128xf32>
    tpu.vector_store %arg3[%c0_24, %c0_25], %48 {strides = array<i32>} : memref<8x128xf32, #tpu.memory_space<vmem>>, vector<8x128xf32>,
    return
  }
}

</mosaic_0001>

<bundles_post_ra>
// kernel: speller_forward.1
= control target key start
LH: loop header
LB: loop body
LE: loop exit
PB: predicated region body
PF: predicated region fallthrough
CT: control target
= control target key end

     0   :  { %8 = vsyncpa [#allocation3], 0  ;;  %s356_s0 = inlined_call_operand.vmem [shape: f32[8,128], index: 0, kind: input, shape index: {}]   ;;  %s357_s1 = inlined_call_operand.hbm [shape: f32[3,128,128], index: 1, kind: input, shape index: {}]   ;;  %s358_s2 = inlined_call_operand.hbm [shape: f32[3,8,128], index: 2, kind: input, shape index: {}]   ;;  %s359_s3 = inlined_call_operand.vmem [shape: f32[8,128], index: 3, kind: output, shape index: {}]  }
   0x1   :  { %s16_s14 = sshll.u32 %s357_s1, 4  ;;  %s17_s14 = int_to_ptr.hbm [resolvable:$true] %s16_s14 }
   0x2   :  { %9 = vsyncpa [#allocation5], 0  ;;  %s306_s15 = smov [#allocation2]   ;;  %s29_s19 = sshll.u32 %s358_s2, 4  ;;  %s30_s19 = int_to_ptr.hbm [resolvable:$true] %s29_s19 }
   0x3   :  { %s18_s16 = sshll.u32 %s306_s15, 4  ;;  %s307_s20 = smov 128   ;;  %s19_s16 = int_to_ptr.vmem [resolvable:$true] %s18_s16 }
   0x4   :  { %s308_s21 = smov 8   ;;  %s309_s22 = smov [#allocation4]  }
   0x5   :  { %24 = dma.hbm_to_vmem [thread:$0]  %s17_s14, 6144, %s19_s16, [#allocation3], %s307_s20, %s307_s20, %s308_s21  }
   0x6   :  { %s31_s23 = sshll.u32 %s309_s22, 4  ;;  %s32_s23 = int_to_ptr.vmem [resolvable:$true] %s31_s23 }
   0x7   :  { %37 = dma.hbm_to_vmem [thread:$0]  %s30_s19, 384, %s32_s23, [#allocation5], %s307_s20, %s307_s20, %s308_s21  }
   0x8   :  { %302 = dma.done.wait [#allocation3], 6144  }
   0x9   :  { %303 = vsyncadd [#allocation3], 4294961152 }
   0xa   :  { %304 = dma.done.wait [#allocation5], 384  }
   0xb   :  { %305 = vsyncadd [#allocation5], 4294966912  ;;  %v67_v0 = vld [vmem:[#allocation2 + $0x78] sm:$0xff]  ;;  %v66_v1 = vld [vmem:[#allocation2 + $0x70] sm:$0xff]  ;;  %v46_v23 = vlaneseq  ;;  %s311_s24 = smov 32  }
   0xc   :  { %69 = vmatpush.msra.mxu0 %v67_v0  ;;  %v65_v2 = vld [vmem:[#allocation2 + $0x68] sm:$0xff]  ;;  %v64_v3 = vld [vmem:[#allocation2 + $0x60] sm:$0xff]  ;;  %v63_v4 = vld [vmem:[#allocation2 + $0x58] sm:$0xff] }
   0xd   :  { %v62_v5 = vld [vmem:[#allocation2 + $0x50] sm:$0xff]  ;;  %v61_v6 = vld [vmem:[#allocation2 + $0x48] sm:$0xff]  ;;  %v60_v7 = vld [vmem:[#allocation2 + $0x40] sm:$0xff]  ;;  %v47_v25 = vand.u32 127, %v46_v23 }
   0xe   :  { %70 = vmatpush.msra.mxu0 %v66_v1  ;;  %v59_v8 = vld [vmem:[#allocation2 + $0x38] sm:$0xff]  ;;  %v58_v9 = vld [vmem:[#allocation2 + $0x30] sm:$0xff]  ;;  %v57_v10 = vld [vmem:[#allocation2 + $0x28] sm:$0xff] }
   0xf   :  { %v56_v11 = vld [vmem:[#allocation2 + $0x20] sm:$0xff]  ;;  %v55_v12 = vld [vmem:[#allocation2 + $0x18] sm:$0xff]  ;;  %v54_v13 = vld [vmem:[#allocation2 + $0x10] sm:$0xff]  ;;  %vm48_vm0 = vcmp.ge.s32.totalorder %v47_v25, 64  ;;  %vm49_vm1 = vcmp.lt.s32.totalorder %v47_v25, 96 }
  0x10   :  { %71 = vmatpush.msra.mxu0 %v65_v2  ;;  %v53_v14 = vld [vmem:[#allocation2 + $0x8] sm:$0xff]  ;;  %v52_v15 = vld [vmem:[#allocation2] sm:$0xff]  ;;  %vm341_vm3 = vmand %vm48_vm0, %vm49_vm1 }
  0x11   :  { %v51_v16 = vld [vmem:[%s356_s0] sm:$0xff]  ;;  %s310_s0 = smov 64   ;;  %v133_v38 = vld [vmem:[#allocation2 + $0xf8] sm:$0xff]  ;;  %v132_v39 = vld [vmem:[#allocation2 + $0xf0] sm:$0xff] }
  0x12   :  { %72 = vmatpush.msra.mxu0 %v64_v3  ;;  %v68_v17 = vld [vmem:[#allocation4] sm:$0xff]  ;;  %136 = vmatpush.msra.mxu1 %v133_v38  ;;  %v131_v40 = vld [vmem:[#allocation2 + $0xe8] sm:$0xff]  ;;  %v129_v42 = vld [vmem:[#allocation2 + $0xd8] sm:$0xff] }
  0x13   :  { %v130_v41 = vld [vmem:[#allocation2 + $0xe0] sm:$0xff]  ;;  %v128_v43 = vld [vmem:[#allocation2 + $0xd0] sm:$0xff]  ;;  %v127_v44 = vld [vmem:[#allocation2 + $0xc8] sm:$0xff] }
  0x14   :  { %73 = vmatpush.msra.mxu0 %v63_v4  ;;  %137 = vmatpush.msra.mxu1 %v132_v39  ;;  %v126_v45 = vld [vmem:[#allocation2 + $0xc0] sm:$0xff]  ;;  %v125_v46 = vld [vmem:[#allocation2 + $0xb8] sm:$0xff]  ;;  %v124_v47 = vld [vmem:[#allocation2 + $0xb0] sm:$0xff] }
  0x15   :  { %v123_v48 = vld [vmem:[#allocation2 + $0xa8] sm:$0xff]  ;;  %v122_v49 = vld [vmem:[#allocation2 + $0xa0] sm:$0xff]  ;;  %v121_v51 = vld [vmem:[#allocation2 + $0x98] sm:$0xff] }
  0x16   :  { %74 = vmatpush.msra.mxu0 %v62_v5  ;;  %138 = vmatpush.msra.mxu1 %v131_v40  ;;  %v120_v53 = vld [vmem:[#allocation2 + $0x90] sm:$0xff]  ;;  %v119_v54 = vld [vmem:[#allocation2 + $0x88] sm:$0xff]  ;;  %v118_v56 = vld [vmem:[#allocation2 + $0x80] sm:$0xff] }
  0x17   :  { %v135_v59 = vld [vmem:[#allocation4 + $0x8] sm:$0xff]  ;;  %v185_v31 = vld [vmem:[#allocation2 + $0x100] sm:$0xff] }
  0x18   :  { %75 = vmatpush.msra.mxu0 %v61_v6  ;;  %139 = vmatpush.msra.mxu1 %v130_v41  ;;  %v190_v23 = vld [vmem:[#allocation2 + $0x128] sm:$0xff] }
  0x1a   :  { %76 = vmatpush.msra.mxu0 %v60_v7  ;;  %140 = vmatpush.msra.mxu1 %v129_v42 }
  0x1c   :  { %77 = vmatpush.msra.mxu0 %v59_v8  ;;  %141 = vmatpush.msra.mxu1 %v128_v43 }
  0x1e   :  { %78 = vmatpush.msra.mxu0 %v58_v9  ;;  %142 = vmatpush.msra.mxu1 %v127_v44 }
  0x20   :  { %79 = vmatpush.msra.mxu0 %v57_v10  ;;  %143 = vmatpush.msra.mxu1 %v126_v45 }
  0x22   :  { %80 = vmatpush.msra.mxu0 %v56_v11  ;;  %144 = vmatpush.msra.mxu1 %v125_v46 }
  0x24   :  { %81 = vmatpush.msra.mxu0 %v55_v12  ;;  %145 = vmatpush.msra.mxu1 %v124_v47 }
  0x26   :  { %82 = vmatpush.msra.mxu0 %v54_v13  ;;  %146 = vmatpush.msra.mxu1 %v123_v48  ;;  %v200_v13 = vld [vmem:[#allocation2 + $0x178] sm:$0xff] }
  0x27   :  { %203 = vmatpush.msra.mxu2 %v200_v13 }
  0x28   :  { %83 = vmatpush.msra.mxu0 %v53_v14  ;;  %147 = vmatpush.msra.mxu1 %v122_v49  ;;  %v199_v14 = vld [vmem:[#allocation2 + $0x170] sm:$0xff] }
  0x29   :  { %204 = vmatpush.msra.mxu2 %v199_v14 }
  0x2a   :  { %84 = vmatpush.msra.mxu0 %v52_v15  ;;  %148 = vmatpush.msra.mxu1 %v121_v51  ;;  %v198_v15 = vld [vmem:[#allocation2 + $0x168] sm:$0xff] }
  0x2b   :  { %85 = vmatmul.f32.vlgmr.msra.gmra.mxu0 %v51_v16  ;;  %v197_v16 = vld [vmem:[#allocation2 + $0x160] sm:$0xff]  ;;  %205 = vmatpush.msra.mxu2 %v198_v15 }
  0x2c   :  { %149 = vmatpush.msra.mxu1 %v120_v53 }
  0x2d   :  { %206 = vmatpush.msra.mxu2 %v197_v16 }
  0x2e   :  { %150 = vmatpush.msra.mxu1 %v119_v54 }
  0x30   :  { %151 = vmatpush.msra.mxu1 %v118_v56 }
  0xa8   :  { %v86_v18 = vpop.f32.mrf.mxu0 }
  0xa9   :  { %v87_v19 = vadd.f32 %v86_v18, %v68_v17  ;;  %v196_v17 = vld [vmem:[#allocation2 + $0x158] sm:$0xff]  ;;  %v195_v18 = vld [vmem:[#allocation2 + $0x150] sm:$0xff] }
  0xaa   :  { %207 = vmatpush.msra.mxu2 %v196_v17 }
  0xab   :  { %v230_v20 = vmul.f32 -1.442695, %v87_v19 }
  0xac   :  { %208 = vmatpush.msra.mxu2 %v195_v18 }
  0xad   :  { %238 = vpow2.f32 %v230_v20  ;;  %v193_v20 = vld [vmem:[#allocation2 + $0x140] sm:$0xff] }
  0xb3   :  { %v239_v21 = vpop.eup %238 }
  0xb4   :  { %v93_v22 = vadd.f32 1.0, %v239_v21  ;;  %v192_v21 = vld [vmem:[#allocation2 + $0x138] sm:$0xff] }
  0xb6   :  { %240 = vrcp.f32 %v93_v22  ;;  %v105_v28 = vand.u32 2147483648, %v93_v22  ;;  %v103_v30 = vand.u32 2147483647, %v93_v22  ;;  %vm99_vm4 = vweird.f32 %v93_v22 }
  0xb7   :  { %242 = vtanh.f32 %v87_v19  ;;  %v194_v19 = vld [vmem:[#allocation2 + $0x148] sm:$0xff] }
  0xb8   :  { %v106_v33 = vor.u32 1.1754944e-38, %v105_v28  ;;  %vm104_vm6 = vcmp.eq.f32.partialorder %v103_v30, 8.507059e+37  ;;  %209 = vmatpush.msra.mxu2 %v194_v19  ;;  %v187_v28 = vld [vmem:[#allocation2 + $0x110] sm:$0xff] }
  0xba   :  { %210 = vmatpush.msra.mxu2 %v193_v20 }
  0xbc   :  { %v241_v24 = vpop.eup %240  ;;  %211 = vmatpush.msra.mxu2 %v192_v21 }
  0xbd   :  { %v95_v26 = vmul.f32 %v241_v24, %v93_v22  ;;  %vm100_vm2 = vweird.f32 %v241_v24  ;;  %v243_v35 = vpop.eup %242  ;;  %v191_v22 = vld [vmem:[#allocation2 + $0x130] sm:$0xff] }
  0xbe   :  { %vm101_vm5 = vmor %vm99_vm4, %vm100_vm2  ;;  %212 = vmatpush.msra.mxu2 %v191_v22 }
  0xbf   :  { %v96_v27 = vsub.f32 1.0, %v95_v26  ;;  %v188_v26 = vld [vmem:[#allocation2 + $0x118] sm:$0xff] }
  0xc0   :  { %213 = vmatpush.msra.mxu2 %v190_v23 }
  0xc1   :  { %v97_v29 = vmul.f32 %v241_v24, %v96_v27 }
  0xc3   :  { %v98_v32 = vadd.f32 %v241_v24, %v97_v29  ;;  %v186_v29 = vld [vmem:[#allocation2 + $0x108] sm:$0xff] }
  0xc5   :  { %v102_v34 = vsel %vm101_vm5, %v241_v24, %v98_v32  ;;  %v189_v24 = vld [vmem:[#allocation2 + $0x120] sm:$0xff] }
  0xc6   :  { %v107_v36 = vsel %vm104_vm6, %v106_v33, %v102_v34  ;;  %214 = vmatpush.msra.mxu2 %v189_v24  ;;  %v202_v34 = vld [vmem:[#allocation4 + $0x10] sm:$0xff] }
  0xc7   :  { %v109_v37 = vsel %vm341_vm3, %v243_v35, %v107_v36 }
  0xc8   :  { %110 = vrot.lane.b32.xlu0 %v109_v37, %s310_s0  ;;  %215 = vmatpush.msra.mxu2 %v188_v26 }
  0xca   :  { %216 = vmatpush.msra.mxu2 %v187_v28 }
  0xcc   :  { %217 = vmatpush.msra.mxu2 %v186_v29 }
  0xce   :  { %218 = vmatpush.msra.mxu2 %v185_v31 }
 0x13a   :  { %v111_v50 = vpop.permute.xlu0 %110 }
 0x13b   :  { %v112_v52 = vmul.f32 %v111_v50, %v109_v37 }
 0x13d   :  { %244 = vtanh.f32 %v112_v52 }
 0x143   :  { %v245_v55 = vpop.eup %244 }
 0x144   :  { %114 = vrot.lane.b32.xlu0 %v245_v55, %s311_s24 }
 0x1b6   :  { %v115_v57 = vpop.permute.xlu0 %114 }
 0x1b7   :  { %v116_v58 = vmul.f32 %v115_v57, %v109_v37 }
 0x1b9   :  { %152 = vmatmul.f32.vlgmr.msra.gmra.mxu1 %v116_v58 }
 0x236   :  { %v153_v60 = vpop.f32.mrf.mxu1 }
 0x237   :  { %v154_v61 = vadd.f32 %v153_v60, %v135_v59 }
 0x239   :  { %v231_v62 = vmul.f32 -1.442695, %v154_v61 }
 0x23b   :  { %246 = vpow2.f32 %v231_v62 }
 0x241   :  { %v247_v63 = vpop.eup %246 }
 0x242   :  { %v160_v0 = vadd.f32 1.0, %v247_v63 }
 0x244   :  { %248 = vrcp.f32 %v160_v0  ;;  %v172_v4 = vand.u32 2147483648, %v160_v0  ;;  %v170_v6 = vand.u32 2147483647, %v160_v0  ;;  %vm166_vm8 = vweird.f32 %v160_v0 }
 0x245   :  { %250 = vtanh.f32 %v154_v61 }
 0x246   :  { %v173_v8 = vor.u32 1.1754944e-38, %v172_v4  ;;  %vm171_vm10 = vcmp.eq.f32.partialorder %v170_v6, 8.507059e+37 }
 0x24a   :  { %v249_v1 = vpop.eup %248 }
 0x24b   :  { %v162_v2 = vmul.f32 %v249_v1, %v160_v0  ;;  %vm167_vm7 = vweird.f32 %v249_v1  ;;  %v251_v10 = vpop.eup %250 }
 0x24c   :  { %vm168_vm9 = vmor %vm166_vm8, %vm167_vm7 }
 0x24d   :  { %v163_v3 = vsub.f32 1.0, %v162_v2 }
 0x24f   :  { %v164_v5 = vmul.f32 %v249_v1, %v163_v3 }
 0x251   :  { %v165_v7 = vadd.f32 %v249_v1, %v164_v5 }
 0x253   :  { %v169_v9 = vsel %vm168_vm9, %v249_v1, %v165_v7 }
 0x254   :  { %v174_v11 = vsel %vm171_vm10, %v173_v8, %v169_v9 }
 0x255   :  { %v176_v12 = vsel %vm341_vm3, %v251_v10, %v174_v11 }
 0x256   :  { %177 = vrot.lane.b32.xlu1 %v176_v12, %s310_s0 }
 0x2c8   :  { %v178_v25 = vpop.permute.xlu1 %177 }
 0x2c9   :  { %v179_v27 = vmul.f32 %v178_v25, %v176_v12 }
 0x2cb   :  { %252 = vtanh.f32 %v179_v27 }
 0x2d1   :  { %v253_v30 = vpop.eup %252 }
 0x2d2   :  { %181 = vrot.lane.b32.xlu1 %v253_v30, %s311_s24 }
 0x344   :  { %v182_v32 = vpop.permute.xlu1 %181 }
 0x345   :  { %v183_v33 = vmul.f32 %v182_v32, %v176_v12 }
 0x347   :  { %219 = vmatmul.f32.vlgmr.msra.gmra.mxu2 %v183_v33 }
 0x3ca   :  { %v220_v35 = vpop.f32.mrf.mxu2 }
 0x3cb   :  { %v221_v36 = vadd.f32 %v220_v35, %v202_v34 }
 0x3cd   :  { %223 = vst [vmem:[%s359_s3] sm:$0xff] %v221_v36 }
 0x3ce   :  { %228 = vsyncpa [#allocation3], 1 }
 0x3cf   :  { %229 = vsyncpa [#allocation5], 1 }

</bundles_post_ra>
